<compile_context>
chip_gen: v5e
topology: v5e:2x2
jax: 0.10.0
libtpu: 0.0.40
codegen_flags: <defaults>
</compile_context>

<pallas_src>
import functools
import math

import jax
import jax.numpy as jnp
from jax.experimental import pallas as pl
from jax.experimental.pallas import tpu as pltpu


def _pe_add_kernel(x_ref, pe_ref, o_ref, *, batch):
    """Eval mode: out = x + pe (pe broadcast over batch along the lane dim)."""
    pe_b = jnp.concatenate([pe_ref[...]] * batch, axis=-1)      # (T, B*D)
    y = x_ref[...].astype(jnp.float32) + pe_b
    o_ref[...] = y.astype(o_ref.dtype)


def _pe_add_dropout_kernel(x_ref, pe_ref, bits_ref, o_ref, *, batch, threshold, scale):
    """Train mode: out = inverted-dropout(x + pe)."""
    pe_b = jnp.concatenate([pe_ref[...]] * batch, axis=-1)      # (T, B*D)
    y = x_ref[...].astype(jnp.float32) + pe_b
    keep = bits_ref[...] >= jnp.int32(threshold)                # P(keep) = 1 - p
    o_ref[...] = jnp.where(keep, y * jnp.float32(scale), 0.0).astype(o_ref.dtype)


def make_positional_encoding(d_model: int, max_len: int = 5000, dtype=jnp.float32):
    """Deterministic buffer identical to the PyTorch __init__ (plain JAX glue)."""
    position = jnp.arange(max_len, dtype=jnp.float32)[:, None]                # [L,1]
    div_term = jnp.exp(
        jnp.arange(0, d_model, 2, dtype=jnp.float32) * (-math.log(10000.0) / d_model)
    )                                                                         # [D/2]
    pe = jnp.zeros((max_len, 1, d_model), dtype=jnp.float32)
    pe = pe.at[:, 0, 0::2].set(jnp.sin(position * div_term))
    pe = pe.at[:, 0, 1::2].set(jnp.cos(position * div_term))
    return pe.astype(dtype)


def _pick_tile_s(S, B, D, itemsize=4, budget_bytes=4 * 1024 * 1024):
    """Sequence-tile rows: sublane-dense (multiple of 8), VMEM-safe on all chips.

    Per grid step Pallas double-buffers the x, bits and out tiles (each
    (T, B*D)) plus a small (T, D) pe tile — keep that working set well under
    the scoped VMEM limit (16 MiB v5e / 32 MiB v6e & v7x, 64 MiB physical v7x).
    """
    bytes_per_row = (3 * B * D + D) * itemsize
    rows = budget_bytes // (2 * max(bytes_per_row, 1))
    rows = max(8, (rows // 8) * 8)
    s_pad = ((S + 7) // 8) * 8
    return min(rows, s_pad)


def positional_encoding_forward(x, pe, *, drop_p=0.1, training=True, rng=None):
    """x: [seq_len, batch, d_model]; pe: [max_len, 1, d_model]."""
    S, B, D = x.shape
    out_dtype = x.dtype

    apply_dropout = bool(training) and drop_p > 0.0
    if apply_dropout and drop_p >= 1.0:
        return jnp.zeros_like(x)

    # Free row-major collapses: [S,B,D] -> [S,B*D] (x/out), [S,1,D] -> [S,D] (pe).
    x2 = x.reshape(S, B * D)
    pe2 = pe[:S, 0, :].astype(jnp.float32)

    tile_s = _pick_tile_s(S, B, D)
    grid = (pl.cdiv(S, tile_s),)
    x_spec = pl.BlockSpec((tile_s, B * D), lambda i: (i, 0))
    pe_spec = pl.BlockSpec((tile_s, D), lambda i: (i, 0))
    out_spec = pl.BlockSpec((tile_s, B * D), lambda i: (i, 0))
    cparams = pltpu.CompilerParams(dimension_semantics=("parallel",))

    if apply_dropout:
        if rng is None:
            rng = jax.random.PRNGKey(0)
        # Uniform 32-bit randoms, viewed as int32 for a single signed compare
        # in-kernel: P(bits < threshold) == drop_p.
        bits = jax.random.bits(rng, (S, B * D), dtype=jnp.uint32)
        bits = jax.lax.bitcast_convert_type(bits, jnp.int32)
        threshold = int(round(drop_p * (1 << 32))) - (1 << 31)
        scale = 1.0 / (1.0 - drop_p)
        kernel = functools.partial(
            _pe_add_dropout_kernel, batch=B, threshold=threshold, scale=scale
        )
        in_specs = [x_spec, pe_spec, x_spec]
        operands = (x2, pe2, bits)
        bytes_accessed = 2 * x2.size * x2.dtype.itemsize + pe2.nbytes + bits.nbytes
        flops = 3 * S * B * D
    else:
        kernel = functools.partial(_pe_add_kernel, batch=B)
        in_specs = [x_spec, pe_spec]
        operands = (x2, pe2)
        bytes_accessed = 2 * x2.size * x2.dtype.itemsize + pe2.nbytes
        flops = S * B * D

    out2 = pl.pallas_call(
        kernel,
        out_shape=jax.ShapeDtypeStruct((S, B * D), out_dtype),
        grid=grid,
        in_specs=in_specs,
        out_specs=out_spec,
        compiler_params=cparams,
        cost_estimate=pl.CostEstimate(
            flops=flops, transcendentals=0, bytes_accessed=bytes_accessed
        ),
    )(*operands)
    return out2.reshape(S, B, D)


if __name__ == "__main__":
    # Shapes implied by the module: [seq_len, batch, d_model] = [8, 2, 32]
    seq_len, batch, d_model = 8, 2, 32
    max_len = 64

    key = jax.random.PRNGKey(0)
    x = jax.random.normal(key, (seq_len, batch, d_model), dtype=jnp.float32)
    pe = make_positional_encoding(d_model, max_len=max_len)

    # Eval mode (dropout == identity) — check against pure-JAX reference.
    out_eval = positional_encoding_forward(x, pe, drop_p=0.1, training=False)
    out_eval = jax.block_until_ready(out_eval)
    ref = x + pe[:seq_len]
    assert out_eval.shape == x.shape and out_eval.dtype == x.dtype
    assert jnp.allclose(out_eval, ref, atol=1e-6), "eval-mode mismatch"

    # Train mode — every element must be 0 (dropped) or ref / (1 - p) (kept).
    p = 0.1
    out_train = positional_encoding_forward(
        x, pe, drop_p=p, training=True, rng=jax.random.PRNGKey(1)
    )
    out_train = jax.block_until_ready(out_train)
    assert out_train.shape == x.shape and out_train.dtype == x.dtype
    scaled = ref / (1.0 - p)
    ok = (jnp.abs(out_train) <= 1e-6) | (jnp.abs(out_train - scaled) <= 1e-4)
    assert bool(jnp.all(ok)), "train-mode dropout mismatch"

    print("KERNEL_OK")
</pallas_src>

<mosaic_0001>
module attributes {stable_mosaic.version = 11 : i64} {
  func.func @_pe_add_kernel(%arg0: i32, %arg1: memref<8x64xf32, #tpu.memory_space<vmem>>, %arg2: memref<8x32xf32, #tpu.memory_space<vmem>>, %arg3: memref<8x64xf32, #tpu.memory_space<vmem>>) attributes {dimension_semantics = [#tpu.dimension_semantics<parallel>], iteration_bounds = array<i64: 1>, scalar_prefetch = 0 : i64, scratch_operands = 0 : i64, tpu.core_type = #tpu.core_type<tc>, window_params = [{transform_indices = @transform_0, window_bounds = array<i64: 8, 64>}, {transform_indices = @transform_1, window_bounds = array<i64: 8, 32>}, {transform_indices = @transform_2, window_bounds = array<i64: 8, 64>}]} {
    %c0 = arith.constant 0 : index
    %c0_0 = arith.constant 0 : index
    %0 = vector.load %arg2[%c0, %c0_0] : memref<8x32xf32, #tpu.memory_space<vmem>>, vector<8x32xf32>
    %1 = tpu.concatenate %0, %0 in 1 : vector<8x32xf32>, vector<8x32xf32> -> vector<8x64xf32>
    %c0_1 = arith.constant 0 : index
    %c0_2 = arith.constant 0 : index
    %2 = vector.load %arg1[%c0_1, %c0_2] : memref<8x64xf32, #tpu.memory_space<vmem>>, vector<8x64xf32>
    %3 = arith.addf %2, %1 : vector<8x64xf32>
    %c0_3 = arith.constant 0 : index
    %c0_4 = arith.constant 0 : index
    %4 = vector.load %arg3[%c0_3, %c0_4] : memref<8x64xf32, #tpu.memory_space<vmem>>, vector<8x64xf32>
    tpu.vector_store %arg3[%c0_3, %c0_4], %3 {strides = array<i32>} : memref<8x64xf32, #tpu.memory_space<vmem>>, vector<8x64xf32>,
    return
  }
  func.func @transform_0(%arg0: i32) -> (i32, i32) {
    %c0_i32 = arith.constant 0 : i32
    %c0_i32_0 = arith.constant 0 : i32
    return %arg0, %c0_i32 : i32, i32
  }
  func.func @transform_1(%arg0: i32) -> (i32, i32) {
    %c0_i32 = arith.constant 0 : i32
    %c0_i32_0 = arith.constant 0 : i32
    return %arg0, %c0_i32 : i32, i32
  }
  func.func @transform_2(%arg0: i32) -> (i32, i32) {
    %c0_i32 = arith.constant 0 : i32
    %c0_i32_0 = arith.constant 0 : i32
    return %arg0, %c0_i32 : i32, i32
  }
}

</mosaic_0001>

<bundles_post_ra>
// kernel: tpu_custom_call.1
= control target key start
LH: loop header
LB: loop body
LE: loop exit
PB: predicated region body
PF: predicated region fallthrough
CT: control target
= control target key end

     0   :  { %7 = vsyncpa [#allocation3], 0  ;;  %s179_s0 = inlined_call_operand.hbm [shape: f32[8,64], index: 0, kind: input, shape index: {}]   ;;  %s180_s1 = inlined_call_operand.hbm [shape: f32[8,32], index: 1, kind: input, shape index: {}]   ;;  %s181_s2 = inlined_call_operand.hbm [shape: f32[8,64], index: 2, kind: output, shape index: {}]  }
   0x1   :  { %8 = vsyncpa [#allocation6], 0 }
   0x2   :  { %9 = vsyncpa [#allocation4], 0  ;;  %s15_s11 = sshll.u32 %s179_s0, 4  ;;  %s151_s12 = smov [#allocation2]   ;;  %s16_s11 = int_to_ptr.hbm [resolvable:$true] %s15_s11 }
   0x3   :  { %s17_s13 = sshll.u32 %s151_s12, 4  ;;  %s26_s16 = sshll.u32 %s180_s1, 4  ;;  %s18_s13 = int_to_ptr.vmem [resolvable:$true] %s17_s13  ;;  %s27_s16 = int_to_ptr.hbm [resolvable:$true] %s26_s16 }
   0x4   :  { %20 = dma.hbm_to_vmem [thread:$0]  %s16_s11, 128, %s18_s13, [#allocation3]  }
   0x5   :  { %s152_s17 = smov [#allocation5]  }
   0x6   :  { %s28_s18 = sshll.u32 %s152_s17, 4  ;;  %s29_s18 = int_to_ptr.vmem [resolvable:$true] %s28_s18 }
   0x7   :  { %31 = dma.hbm_to_vmem [thread:$0]  %s27_s16, 128, %s29_s18, [#allocation6]  }
   0x8   :  { %145 = dma.done.wait [#allocation3], 128  }
   0x9   :  { %146 = vsyncadd [#allocation3], 4294967168 }
   0xa   :  { %147 = dma.done.wait [#allocation6], 128  }
   0xb   :  { %148 = vsyncadd [#allocation6], 4294967168  ;;  %v40_v0 = vld [vmem:[#allocation5] sm:$0xff]  ;;  %s153_s0 = smov 32   ;;  %vm45_vm0 = vcmask 261120   ;;  %v47_v1 = vld [vmem:[#allocation2] sm:$0xff] }
   0xc   :  { %42 = vrot.lane.b32.xlu0 %v40_v0, %s153_s0  ;;  %s154_s19 = smov [#allocation7]   ;;  %s58_s1 = sshll.u32 %s181_s2, 4  ;;  %vm49_vm1 = vcmask 523264   ;;  %s59_s1 = int_to_ptr.hbm [resolvable:$true] %s58_s1 }
   0xd   :  { %s56_s20 = sshll.u32 %s154_s19, 4  ;;  %s57_s20 = int_to_ptr.vmem [resolvable:$true] %s56_s20 }
  0x7e   :  { %v43_v2 = vpop.permute.xlu0 %42 }
  0x7f   :  { %v46_v3 = vsel %vm45_vm0, %v40_v0, %v43_v2 }
  0x80   :  { %v48_v4 = vadd.f32 %v47_v1, %v46_v3 }
  0x82   :  { %50 = vst.msk [vmem:[#allocation7] sm:$0xff] %vm49_vm1, %v48_v4 }
  0x83   :  { %61 = dma.vmem_to_hbm [thread:$0]  %s57_s20, 128, %s59_s1, [#allocation4]  }
  0x84   :  { %149 = dma.done.wait [#allocation4], 128  }
  0x85   :  { %150 = vsyncadd [#allocation4], 4294967168 }
  0x86   :  { %66 = vsyncpa [#allocation3], 1 }
  0x87   :  { %67 = vsyncpa [#allocation6], 1 }
  0x88   :  { %68 = vsyncpa [#allocation4], 1 }

</bundles_post_ra>
